<compile_context>
chip_gen: v7x
topology: tpu7x:2x2x1
jax: 0.10.0
libtpu: 0.0.40
codegen_flags: <defaults>
</compile_context>

<pallas_src>
import jax
import jax.numpy as jnp
from jax import lax
from jax.experimental import pallas as pl
from jax.experimental.pallas import tpu as pltpu


# ----------------------------------------------------------------------------
# Pallas kernel: single merged banded matmul + bias + ReLU + residual add
# ----------------------------------------------------------------------------
def gam_kernel(x_ref, rgb_ref, w_ref, b_ref, o_ref, xcat_ref):
    # x_ref   : (H, K)     bf16 lane-packed conv input, K = W*Cin
    # rgb_ref : (H, CP)    f32  lane-packed residual branch, CP = W*Cout
    # w_ref   : (3K, CP)   bf16 merged, BN-folded banded conv weight
    # b_ref   : (1, CP)    f32  BN-folded bias, tiled over W
    # o_ref   : (H, CP)    f32  output
    # xcat_ref: (H, 3K)    bf16 scratch: [x(y-1) | x(y) | x(y+1)] per row
    H, K = x_ref.shape

    # Build the row-shifted dy bands in registers (f32 for the sublane shifts;
    # bf16<->f32 round-trips are lossless) and store them with full-height,
    # sublane-aligned stores at lane offsets 0 / K / 2K.  Halo rows are
    # explicit zeros, so every element of xcat is rewritten each step: no
    # zero-init pass, no cross-step invariant.
    x = x_ref[...].astype(jnp.float32)
    zrow = jnp.zeros((1, K), jnp.float32)
    x_up = jnp.concatenate([zrow, x[: H - 1, :]], axis=0)   # row y-1 (0 at y=0)
    x_dn = jnp.concatenate([x[1:, :], zrow], axis=0)        # row y+1 (0 at y=H-1)

    xcat_ref[:, pl.ds(0, K)] = x_up.astype(jnp.bfloat16)
    xcat_ref[:, pl.ds(K, K)] = x_ref[...]
    xcat_ref[:, pl.ds(2 * K, K)] = x_dn.astype(jnp.bfloat16)

    # One MXU push/drain: (H, 3K) bf16 @ (3K, CP) bf16 -> (H, CP) f32.
    acc = jnp.dot(xcat_ref[...], w_ref[...], preferred_element_type=jnp.float32)

    # Folded-BN bias + ReLU + residual add, all in f32.
    acc = jnp.maximum(acc + b_ref[...], 0.0)
    o_ref[...] = (acc + rgb_ref[...]).astype(o_ref.dtype)


def gam_pallas(pre_packed, rgb_packed, w_merged, bias_packed):
    """pre_packed: (N, H, W*Cin) bf16, rgb_packed: (N, H, W*Cout) f32."""
    N, H, K = pre_packed.shape           # K  = W*Cin
    CP = rgb_packed.shape[-1]            # CP = W*Cout (lane-dense, 128 here)
    K3 = w_merged.shape[0]               # 3*K

    # Lane-layout assumptions (documented per review): lane-dense output and
    # a conv-input K that fits a single lane tile.  Other sizes stay correct
    # but fall back to masked partial stores.
    assert K3 == 3 * K, "merged weight must have 3*W*Cin rows"
    assert CP % 128 == 0, f"W*Cout = {CP} should be a multiple of 128"
    assert K <= 128, f"W*Cin = {K} expected to fit one lane tile"

    return pl.pallas_call(
        gam_kernel,
        out_shape=jax.ShapeDtypeStruct((N, H, CP), jnp.float32),
        grid_spec=pltpu.PrefetchScalarGridSpec(
            num_scalar_prefetch=0,
            grid=(N,),                   # N == 2 -> one step per v7x core
            in_specs=[
                pl.BlockSpec((None, H, K), lambda n: (n, 0, 0)),
                pl.BlockSpec((None, H, CP), lambda n: (n, 0, 0)),
                # Grid-invariant operands: constant index_map => no re-DMA.
                # TODO(synk): add pipeline_mode=pl.Buffered(1) once the weight
                #             is large enough for double-buffering to matter.
                pl.BlockSpec((K3, CP), lambda n: (0, 0)),
                pl.BlockSpec((1, CP), lambda n: (0, 0)),
            ],
            out_specs=pl.BlockSpec((None, H, CP), lambda n: (n, 0, 0)),
            scratch_shapes=[pltpu.VMEM((H, K3), jnp.bfloat16)],
        ),
        compiler_params=pltpu.CompilerParams(
            dimension_semantics=("parallel",),    # batch axis independent
            vmem_limit_bytes=32 * 1024 * 1024,    # explicit budget (v7x-safe)
        ),
    )(pre_packed, rgb_packed, w_merged, bias_packed)


# ----------------------------------------------------------------------------
# Plain-JAX glue
# ----------------------------------------------------------------------------
# TODO(synk): bilinear align_corners resize stays in plain JAX (gather-heavy,
#             no Pallas win at these sizes).
def bilinear_resize_align_corners(x_nhwc, out_hw):
    """Bilinear resize with align_corners=True (PyTorch F.interpolate)."""
    N, H, W, C = x_nhwc.shape
    Ho, Wo = out_hw

    def coords(n_in, n_out):
        if n_out == 1 or n_in == 1:
            src = jnp.zeros((n_out,), jnp.float32)
        else:
            src = jnp.arange(n_out, dtype=jnp.float32) * (n_in - 1) / (n_out - 1)
        lo = jnp.clip(jnp.floor(src).astype(jnp.int32), 0, max(n_in - 2, 0))
        frac = src - lo.astype(jnp.float32)
        hi = jnp.clip(lo + 1, 0, n_in - 1)
        return lo, hi, frac

    y0, y1, wy = coords(H, Ho)
    x0, x1, wx = coords(W, Wo)

    top = x_nhwc[:, y0, :, :]
    bot = x_nhwc[:, y1, :, :]
    tl, tr = top[:, :, x0, :], top[:, :, x1, :]
    bl, br = bot[:, :, x0, :], bot[:, :, x1, :]

    wy = wy[None, :, None, None]
    wx = wx[None, None, :, None]
    t = tl * (1 - wx) + tr * wx
    b = bl * (1 - wx) + br * wx
    return t * (1 - wy) + b * wy


def fold_bn(w_oihw, conv_b, gamma, beta, mean, var, eps=1e-5):
    """Fold BatchNorm (inference) into conv weight/bias. Returns HWIO weight."""
    s = gamma / jnp.sqrt(var + eps)                       # (Cout,)
    w_folded = w_oihw * s[:, None, None, None]
    b_folded = (conv_b - mean) * s + beta
    w_hwio = jnp.transpose(w_folded, (2, 3, 1, 0))        # (3,3,Cin,Cout)
    return w_hwio, b_folded


def build_banded_weight(w_hwio, W):
    """Merged banded weight, shape (3*W*Cin, W*Cout).

    W_merged[dy*W*Cin + xx*Cin + ci, x*Cout + co] = w[dy, xx-x+1, ci, co]
    (zero outside the 3-tap band).  Folds the dx taps, channel mixing and the
    W-direction zero padding; dy bands are stacked along K so the 3x3 conv is
    a single matmul against the row-shifted input bands.
    """
    KH, KW, Cin, Cout = w_hwio.shape
    xx = jnp.arange(W)[:, None]          # input column
    xo = jnp.arange(W)[None, :]          # output column
    dx = xx - xo + 1                     # kernel column tap, valid in [0, KW)
    valid = (dx >= 0) & (dx < KW)
    dxc = jnp.clip(dx, 0, KW - 1)
    b5 = w_hwio[:, dxc, :, :]                              # (KH, W_in, W_out, Cin, Cout)
    b5 = jnp.where(valid[None, :, :, None, None], b5, 0.0)
    b5 = jnp.transpose(b5, (0, 1, 3, 2, 4))                # (KH, W_in, Cin, W_out, Cout)
    return b5.reshape(KH * W * Cin, W * Cout)


def gam_forward(rgb_nchw, pre_nchw, params):
    """Full GAM forward. Inputs NCHW (PyTorch convention), output NCHW."""
    w_hwio, b_folded = fold_bn(params["w"], params["b"], params["gamma"],
                               params["beta"], params["mean"], params["var"])
    rgb_nhwc = jnp.transpose(rgb_nchw, (0, 2, 3, 1))
    pre_nhwc = jnp.transpose(pre_nchw, (0, 2, 3, 1))
    N, H, W, Cout = rgb_nhwc.shape
    Cin = pre_nhwc.shape[-1]

    pre_resized = bilinear_resize_align_corners(pre_nhwc, (H, W))

    # Lane-dense packing; bf16 conv operands (residual/output stay f32).
    pre_packed = pre_resized.reshape(N, H, W * Cin).astype(jnp.bfloat16)
    rgb_packed = rgb_nhwc.reshape(N, H, W * Cout)
    w_merged = build_banded_weight(w_hwio, W).astype(jnp.bfloat16)
    bias_packed = jnp.tile(b_folded, W).reshape(1, W * Cout)

    out_packed = gam_pallas(pre_packed, rgb_packed, w_merged, bias_packed)
    out_nhwc = out_packed.reshape(N, H, W, Cout)
    return jnp.transpose(out_nhwc, (0, 3, 1, 2))          # back to NCHW


def gam_reference(rgb_nchw, pre_nchw, params, cast_bf16=True):
    """Pure-JAX reference (no Pallas).  cast_bf16=True mirrors the kernel's
    mixed precision (bf16 conv operands, f32 accumulation)."""
    w_hwio, b_folded = fold_bn(params["w"], params["b"], params["gamma"],
                               params["beta"], params["mean"], params["var"])
    rgb_nhwc = jnp.transpose(rgb_nchw, (0, 2, 3, 1))
    pre_nhwc = jnp.transpose(pre_nchw, (0, 2, 3, 1))
    H, W = rgb_nhwc.shape[1], rgb_nhwc.shape[2]
    pre_resized = bilinear_resize_align_corners(pre_nhwc, (H, W))
    if cast_bf16:
        pre_resized = pre_resized.astype(jnp.bfloat16).astype(jnp.float32)
        w_hwio = w_hwio.astype(jnp.bfloat16).astype(jnp.float32)
    conv = lax.conv_general_dilated(
        pre_resized, w_hwio, window_strides=(1, 1), padding=((1, 1), (1, 1)),
        dimension_numbers=("NHWC", "HWIO", "NHWC"),
        precision=lax.Precision.HIGHEST)
    out = jnp.maximum(conv + b_folded[None, None, None, :], 0.0) + rgb_nhwc
    return jnp.transpose(out, (0, 3, 1, 2))


# ----------------------------------------------------------------------------
if __name__ == "__main__":
    N, ch_1, ch_2 = 2, 4, 8
    H, W = 16, 16          # rgb spatial (target size); W*ch_2 = 128 lanes
    Hp, Wp = 8, 8          # pre spatial (gets upsampled to 16x16)

    key = jax.random.PRNGKey(0)
    k_rgb, k_pre, k_w, k_b, k_g, k_be, k_m, k_v = jax.random.split(key, 8)

    rgb = jax.random.normal(k_rgb, (N, ch_2, H, W), jnp.float32)
    pre = jax.random.normal(k_pre, (N, ch_1, Hp, Wp), jnp.float32)

    params = {
        "w": 0.1 * jax.random.normal(k_w, (ch_2, ch_1, 3, 3), jnp.float32),
        "b": 0.05 * jax.random.normal(k_b, (ch_2,), jnp.float32),
        "gamma": 1.0 + 0.1 * jax.random.normal(k_g, (ch_2,), jnp.float32),
        "beta": 0.1 * jax.random.normal(k_be, (ch_2,), jnp.float32),
        "mean": 0.1 * jax.random.normal(k_m, (ch_2,), jnp.float32),
        "var": jnp.abs(1.0 + 0.1 * jax.random.normal(k_v, (ch_2,), jnp.float32)),
    }

    out = jax.block_until_ready(gam_forward(rgb, pre, params))
    assert out.shape == (N, ch_2, H, W)

    # Tight check vs a reference using the same bf16 conv operands.
    ref_bf16 = jax.block_until_ready(gam_reference(rgb, pre, params, cast_bf16=True))
    assert jnp.allclose(out, ref_bf16, atol=1e-3, rtol=1e-3), \
        "mismatch vs bf16-matched reference"

    # Loose sanity check vs the pure-f32 reference (only bf16 operand rounding).
    ref_f32 = jax.block_until_ready(gam_reference(rgb, pre, params, cast_bf16=False))
    assert jnp.allclose(out, ref_f32, atol=5e-2, rtol=5e-2), \
        "mismatch vs f32 reference"

    print("KERNEL_OK")
</pallas_src>

<mosaic_0001>
module attributes {stable_mosaic.version = 11 : i64} {
  func.func @gam_kernel(%arg0: i32, %arg1: memref<1x16x64xbf16, #tpu.memory_space<vmem>>, %arg2: memref<1x16x128xf32, #tpu.memory_space<vmem>>, %arg3: memref<192x128xbf16, #tpu.memory_space<vmem>>, %arg4: memref<1x128xf32, #tpu.memory_space<vmem>>, %arg5: memref<1x16x128xf32, #tpu.memory_space<vmem>>, %arg6: memref<16x192xbf16, #tpu.memory_space<vmem>>) attributes {dimension_semantics = [#tpu.dimension_semantics<parallel>], iteration_bounds = array<i64: 2>, scalar_prefetch = 0 : i64, scratch_operands = 1 : i64, tpu.core_type = #tpu.core_type<tc>, window_params = [{transform_indices = @transform_0, window_bounds = array<i64: 1, 16, 64>}, {transform_indices = @transform_1, window_bounds = array<i64: 1, 16, 128>}, {pipeline_mode = #tpu.pipeline_mode<synchronous>, transform_indices = @transform_2, window_bounds = array<i64: 192, 128>}, {pipeline_mode = #tpu.pipeline_mode<synchronous>, transform_indices = @transform_3, window_bounds = array<i64: 1, 128>}, {transform_indices = @transform_4, window_bounds = array<i64: 1, 16, 128>}]} {
    %c0 = arith.constant 0 : index
    %c0_0 = arith.constant 0 : index
    %c0_1 = arith.constant 0 : index
    %0 = vector.load %arg1[%c0, %c0_0, %c0_1] : memref<1x16x64xbf16, #tpu.memory_space<vmem>>, vector<1x16x64xbf16>
    %1 = vector.shape_cast %0 : vector<1x16x64xbf16> to vector<16x64xbf16>
    %2 = arith.extf %1 : vector<16x64xbf16> to vector<16x64xf32>
    %cst = arith.constant 0.000000e+00 : f32
    %3 = vector.broadcast %cst : f32 to vector<1x64xf32>
    %4 = vector.extract_strided_slice %2 {offsets = [0, 0], sizes = [15, 64], strides = [1, 1]} : vector<16x64xf32> to vector<15x64xf32>
    %5 = tpu.concatenate %3, %4 in 0 : vector<1x64xf32>, vector<15x64xf32> -> vector<16x64xf32>
    %6 = vector.extract_strided_slice %2 {offsets = [1, 0], sizes = [15, 64], strides = [1, 1]} : vector<16x64xf32> to vector<15x64xf32>
    %7 = tpu.concatenate %6, %3 in 0 : vector<15x64xf32>, vector<1x64xf32> -> vector<16x64xf32>
    %8 = arith.truncf %5 : vector<16x64xf32> to vector<16x64xbf16>
    %c0_2 = arith.constant 0 : index
    %c0_3 = arith.constant 0 : index
    %9 = vector.load %arg6[%c0_2, %c0_3] : memref<16x192xbf16, #tpu.memory_space<vmem>>, vector<16x64xbf16>
    tpu.vector_store %arg6[%c0_2, %c0_3], %8 {strides = array<i32>} : memref<16x192xbf16, #tpu.memory_space<vmem>>, vector<16x64xbf16>,
    %c0_4 = arith.constant 0 : index
    %c0_5 = arith.constant 0 : index
    %c0_6 = arith.constant 0 : index
    %10 = vector.load %arg1[%c0_4, %c0_5, %c0_6] : memref<1x16x64xbf16, #tpu.memory_space<vmem>>, vector<1x16x64xbf16>
    %11 = vector.shape_cast %10 : vector<1x16x64xbf16> to vector<16x64xbf16>
    %c0_7 = arith.constant 0 : index
    %c64 = arith.constant 64 : index
    %12 = vector.load %arg6[%c0_7, %c64] : memref<16x192xbf16, #tpu.memory_space<vmem>>, vector<16x64xbf16>
    tpu.vector_store %arg6[%c0_7, %c64], %11 {strides = array<i32>} : memref<16x192xbf16, #tpu.memory_space<vmem>>, vector<16x64xbf16>,
    %13 = arith.truncf %7 : vector<16x64xf32> to vector<16x64xbf16>
    %c0_8 = arith.constant 0 : index
    %c128 = arith.constant 128 : index
    %14 = vector.load %arg6[%c0_8, %c128] : memref<16x192xbf16, #tpu.memory_space<vmem>>, vector<16x64xbf16>
    tpu.vector_store %arg6[%c0_8, %c128], %13 {strides = array<i32>} : memref<16x192xbf16, #tpu.memory_space<vmem>>, vector<16x64xbf16>,
    %c0_9 = arith.constant 0 : index
    %c0_10 = arith.constant 0 : index
    %15 = vector.load %arg6[%c0_9, %c0_10] : memref<16x192xbf16, #tpu.memory_space<vmem>>, vector<16x192xbf16>
    %c0_11 = arith.constant 0 : index
    %c0_12 = arith.constant 0 : index
    %16 = vector.load %arg3[%c0_11, %c0_12] : memref<192x128xbf16, #tpu.memory_space<vmem>>, vector<192x128xbf16>
    %cst_13 = arith.constant dense<0.000000e+00> : vector<16x128xf32>
    %17 = tpu.matmul %15, %16, %cst_13 {dimension_numbers = #tpu.dot_dimension_numbers<[1], [0], [0], [1], [0, 0, 1, 1], [], []>} : vector<16x192xbf16>, vector<192x128xbf16>, vector<16x128xf32> -> vector<16x128xf32>
    %c0_14 = arith.constant 0 : index
    %c0_15 = arith.constant 0 : index
    %18 = vector.load %arg4[%c0_14, %c0_15] : memref<1x128xf32, #tpu.memory_space<vmem>>, vector<1x128xf32>
    %19 = vector.broadcast %18 : vector<1x128xf32> to vector<16x128xf32>
    %20 = arith.addf %17, %19 : vector<16x128xf32>
    %cst_16 = arith.constant 0.000000e+00 : f32
    %21 = vector.broadcast %cst_16 : f32 to vector<16x128xf32>
    %22 = arith.maximumf %20, %21 : vector<16x128xf32>
    %c0_17 = arith.constant 0 : index
    %c0_18 = arith.constant 0 : index
    %c0_19 = arith.constant 0 : index
    %23 = vector.load %arg2[%c0_17, %c0_18, %c0_19] : memref<1x16x128xf32, #tpu.memory_space<vmem>>, vector<1x16x128xf32>
    %24 = vector.shape_cast %23 : vector<1x16x128xf32> to vector<16x128xf32>
    %25 = arith.addf %22, %24 : vector<16x128xf32>
    %c0_20 = arith.constant 0 : index
    %c0_21 = arith.constant 0 : index
    %c0_22 = arith.constant 0 : index
    %26 = vector.load %arg5[%c0_20, %c0_21, %c0_22] : memref<1x16x128xf32, #tpu.memory_space<vmem>>, vector<1x16x128xf32>
    %27 = vector.shape_cast %26 : vector<1x16x128xf32> to vector<16x128xf32>
    %28 = vector.shape_cast %25 : vector<16x128xf32> to vector<1x16x128xf32>
    tpu.vector_store %arg5[%c0_20, %c0_21, %c0_22], %28 {strides = array<i32>} : memref<1x16x128xf32, #tpu.memory_space<vmem>>, vector<1x16x128xf32>,
    return
  }
  func.func @transform_0(%arg0: i32) -> (i32, i32, i32) {
    %c0_i32 = arith.constant 0 : i32
    %c0_i32_0 = arith.constant 0 : i32
    %c0_i32_1 = arith.constant 0 : i32
    return %arg0, %c0_i32, %c0_i32_0 : i32, i32, i32
  }
  func.func @transform_1(%arg0: i32) -> (i32, i32, i32) {
    %c0_i32 = arith.constant 0 : i32
    %c0_i32_0 = arith.constant 0 : i32
    %c0_i32_1 = arith.constant 0 : i32
    return %arg0, %c0_i32, %c0_i32_0 : i32, i32, i32
  }
  func.func @transform_2(%arg0: i32) -> (i32, i32) {
    %c0_i32 = arith.constant 0 : i32
    %c0_i32_0 = arith.constant 0 : i32
    %c0_i32_1 = arith.constant 0 : i32
    return %c0_i32, %c0_i32_0 : i32, i32
  }
  func.func @transform_3(%arg0: i32) -> (i32, i32) {
    %c0_i32 = arith.constant 0 : i32
    %c0_i32_0 = arith.constant 0 : i32
    %c0_i32_1 = arith.constant 0 : i32
    return %c0_i32, %c0_i32_0 : i32, i32
  }
  func.func @transform_4(%arg0: i32) -> (i32, i32, i32) {
    %c0_i32 = arith.constant 0 : i32
    %c0_i32_0 = arith.constant 0 : i32
    %c0_i32_1 = arith.constant 0 : i32
    return %arg0, %c0_i32, %c0_i32_0 : i32, i32, i32
  }
}

</mosaic_0001>

<bundles_post_ra>
// kernel: tpu_custom_call.1
= control target key start
LH: loop header
LB: loop body
LE: loop exit
PB: predicated region body
PF: predicated region fallthrough
CT: control target
= control target key end

     0   :  { %s1178_s0 = inlined_call_operand.hbm [shape: bf16[2,16,64], index: 0, kind: input, shape index: {}]   ;;  %s1179_s1 = inlined_call_operand.hbm [shape: f32[2,16,128], index: 1, kind: input, shape index: {}]   ;;  %s1180_s2 = inlined_call_operand.hbm [shape: bf16[192,128], index: 2, kind: input, shape index: {}]   ;;  %s1181_s3 = inlined_call_operand.vmem [shape: f32[1,128], index: 3, kind: input, shape index: {}]   ;;  %s1182_s4 = inlined_call_operand.hbm [shape: f32[2,16,128], index: 4, kind: output, shape index: {}]  }
   0x1   :  { %1186 = sst [smem:[#allocation14_spill]] %s1178_s0 }
   0x2   :  { %1187 = sst [smem:[#allocation15_spill]] %s1180_s2 }
   0x3   :  { %9 = vsyncpa [#allocation4], 0 }
   0x4   :  { %11 = vsyncpa [#allocation4 + $0x1], 0 }
   0x5   :  { %12 = vsyncpa [#allocation7], 0 }
   0x6   :  { %14 = vsyncpa [#allocation7 + $0x1], 0 }
   0x7   :  { %15 = vsyncpa [#allocation5], 0 }
   0x8   :  { %17 = vsyncpa [#allocation5 + $0x1], 0  ;;  %s910_s15 = smov 0   ;;  %s912_s16 = smov 0  }
   0x9   :  { %s914_s17 = smov 0   ;;  %s916_s18 = smov 0  }
   0xa LB: > { %s931_s19 = sadd.s32 4294967295, %s871_s18   ;;  %s584_s20 = sadd.s32 4294967294, %s871_s18   ;;  %s871_s18 = sphi %s916_s18, %s1206_s18   ;;  %s867_s17 = sphi %s914_s17, %s1205_s17   ;;  %s863_s16 = sphi %s912_s16, %s1204_s16   ;;  %s859_s15 = sphi %s910_s15, %s1203_s15  }
   0xb   : > { %p43_p0 = scmp.ne.s32.totalorder %s863_s16, %s859_s15  ;;  %p1183_p1 = scmp.eq.s32.totalorder %s931_s19, 0 }
   0xc   : > { %p141_p3 = scmp.eq.s32.totalorder %s584_s20, 1  ;;  %p585_p5 = scmp.ge.s32.totalorder %s871_s18, 1 }
   0xd   : > { %p940_p4 = por %p1183_p1, %p43_p0  ;;  %p148_p7 = scmp.lt.s32.totalorder %s871_s18, 3 }
   0xe   : > { %p945_p6 = por %p141_p3, %p43_p0  ;;  %s873_s24 = smov [#allocation8]  }
   0xf   : > { %s1188_s21 = scalar_select %p940_p4, 1, 0 }
  0x10   : > { %s1189_s22 = scalar_select %p945_p6, 1, 0 }
  0x11   : > { %p950_p8 = pnand %p585_p5, %p148_p7  ;;  %s160_s25 = sshll.u32 %s873_s24, 4  ;;  %s954_s25 = int_to_ptr.vmem [resolvable:$true] %s160_s25 }
  0x12   : > { %s966_s27 = sadd.s32 1, %s871_s18   ;;  %s30_s28 = sadd.s32 1, %s867_s17 }
  0x13   : > { %s1190_s23 = scalar_select %p950_p8, 1, 0 }
  0x14   : > { %p636_p9 = pneg %p950_p8  ;;  %s27_s29 = ssub.s32 %s871_s18, %s966_s27 }
  0x15   : > { %s1192_s2 = sld [smem:[#allocation15_spill]] }
  0x16   : > { %p961_p11 = pnand %p636_p9, %p1183_p1 }
  0x18   : > { %p711_p13 = pneg %p961_p11 }
  0x1b   : > { %s709_s6 = scalar_lea.hbm %s1192_s2, 1536 }
  0x1c   : > { %p710_p12 = scmp.ne.s32.totalorder %s1192_s2, %s709_s6  ;;  %p716_p5 = scmp.lt.u32.totalorder %s709_s6, %s1192_s2 }
  0x1e   : > { %p712_p0 = pnand %p711_p13, %p710_p12 }
  0x20   : > { %p713_p3 = pneg %p712_p0 }
  0x22   : > { %p718_p7 = pnand %p716_p5, %p713_p3 }
  0x24   : > { %721 = shalt.err (!%p718_p7)
}
  0x25   : > { %s722_s11 = scalar_lea.vmem %s954_s25, 1536  ;;  %p730_p2 = scmp.lt.s32.totalorder %s954_s25, %s954_s25 }
  0x26   : > { %p723_p9 = scmp.ne.s32.totalorder %s954_s25, %s722_s11  ;;  %p731_p6 = scmp.lt.s32.totalorder %s722_s11, %s722_s11 }
  0x28   : > { %p725_p10 = pnand %p723_p9, %p711_p13  ;;  %p732_p4 = por %p731_p6, %p730_p2 }
  0x2a   : > { %p726_p1 = pneg %p725_p10 }
  0x2c   : > { %p733_p8 = pnand %p732_p4, %p726_p1 }
  0x2e   : > { %736 = shalt.err (!%p733_p8)
}
  0x2f   : > { %s874_s12 = smov 64   ;;  %s875_s13 = smov 4  }
  0x30   : > { %639 = dma.hbm_to_vmem [thread:$0]  (!%p961_p11), %s1192_s2, 1536, %s954_s25, [#allocation7], %s874_s12, %s874_s12, %s875_s13  }
  0x31   : > { %p28_p1 = scmp.eq.s32.totalorder %s27_s29, 0  ;;  %p37_p2 = scmp.ne.s32.totalorder %s867_s17, %s863_s16 }
  0x32   : > { %p38_p4 = scmp.eq.s32.totalorder %s871_s18, 0  ;;  %p652_p6 = scmp.lt.s32.totalorder %s871_s18, 2 }
  0x33   : > { %s1000_s24 = scalar_select %p28_p1, %s867_s17, %s30_s28  }
  0x34   : > { %p39_p8 = por %p38_p4, %p37_p2  ;;  %p1193_p10 = scmp.eq.s32.totalorder %s931_s19, 1 }
  0x35   : > { %s1009_s26 = sand.u32 1, %s867_s17   ;;  %s619_s5 = sshll.u32 %s871_s18, 7 }
  0x36   : > { %p1004_p12 = por %p1193_p10, %p37_p2  ;;  %s588_s6 = sshll.u32 %s1009_s26, 3 }
  0x37   : > { %s1195_s0 = sld [smem:[#allocation14_spill]]  ;;  %s181_s28 = scalar_lea.vmem [#allocation3], %s588_s6 }
  0x38   : > { %s188_s8 = sshll.u32 %s181_s28, 4  ;;  %p1018_p11 = pnand %p652_p6, %p39_p8  ;;  %s1022_s8 = int_to_ptr.vmem [resolvable:$true] %s188_s8 }
  0x39   : > { %s198_s10 = sand.u32 1, %s871_s18   ;;  %s178_s11 = scalar_lea.sflag [#allocation4], %s1009_s26 }
  0x3a   : > { %p739_p0 = pneg %p1018_p11 }
  0x3d   : > { %s1016_s29 = scalar_lea.hbm %s1195_s0, %s619_s5  ;;  %s742_s6 = scalar_lea.hbm %s1195_s0, 256 }
  0x3e   : > { %s737_s14 = scalar_lea.hbm %s1016_s29, 128  ;;  %p743_p7 = scmp.lt.u32.totalorder %s1016_s29, %s1195_s0 }
  0x3f   : > { %p738_p13 = scmp.ne.s32.totalorder %s1016_s29, %s737_s14  ;;  %p744_p9 = scmp.lt.u32.totalorder %s742_s6, %s737_s14 }
  0x40   : > { %p746_p2 = scmp.lt.u32.totalorder %s737_s14, %s1016_s29 }
  0x41   : > { %p740_p3 = pnand %p739_p0, %p738_p13  ;;  %p745_p1 = por %p744_p9, %p743_p7 }
  0x43   : > { %p741_p5 = pneg %p740_p3  ;;  %p747_p4 = por %p746_p2, %p745_p1 }
  0x45   : > { %p748_p6 = pnand %p747_p4, %p741_p5 }
  0x47   : > { %751 = shalt.err (!%p748_p6)
}
  0x48   : > { %s752_s28 = scalar_lea.vmem %s1022_s8, 128  ;;  %s876_s20 = smov [#allocation3]  }
  0x49   : > { %p753_p8 = scmp.ne.s32.totalorder %s1022_s8, %s752_s28  ;;  %s757_s5 = sshll.u32 %s876_s20, 4  ;;  %s758_s5 = int_to_ptr.vmem [resolvable:$false] %s757_s5 }
  0x4a   : > { %s759_s25 = scalar_lea.vmem %s758_s5, 256  ;;  %p760_p3 = scmp.lt.s32.totalorder %s1022_s8, %s758_s5 }
  0x4b   : > { %p755_p10 = pnand %p753_p8, %p739_p0  ;;  %p761_p7 = scmp.lt.s32.totalorder %s759_s25, %s752_s28 }
  0x4d   : > { %p756_p13 = pneg %p755_p10  ;;  %p762_p9 = por %p761_p7, %p760_p3 }
  0x4f   : > { %p763_p1 = pnand %p762_p9, %p756_p13 }
  0x51   : > { %766 = shalt.err (!%p763_p1)
}
  0x52   : > { %643 = dma.hbm_to_vmem [thread:$0]  (!%p1018_p11), %s1016_s29, 128, %s1022_s8, %s178_s11, %s874_s12, %s874_s12, %s875_s13  }
  0x53   : > { %s591_s14 = sshll.u32 %s1009_s26, 4  ;;  %s620_s6 = sshll.u32 %s871_s18, 8 }
  0x54   : > { %s1061_s20 = scalar_lea.hbm %s1179_s1, %s620_s6  ;;  %s202_s5 = scalar_lea.vmem [#allocation6], %s591_s14 }
  0x55   : > { %s209_s25 = sshll.u32 %s202_s5, 4  ;;  %s1067_s0 = scalar_lea.sflag [#allocation7], %s198_s10  ;;  %s1063_s25 = int_to_ptr.vmem [resolvable:$true] %s209_s25 }
  0x56   : > { %s767_s2 = scalar_lea.hbm %s1061_s20, 256  ;;  %s772_s26 = scalar_lea.hbm %s1179_s1, 512 }
  0x57   : > { %p768_p5 = scmp.ne.s32.totalorder %s1061_s20, %s767_s2  ;;  %p773_p6 = scmp.lt.u32.totalorder %s1061_s20, %s1179_s1 }
  0x58   : > { %p774_p8 = scmp.lt.u32.totalorder %s772_s26, %s767_s2  ;;  %p776_p13 = scmp.lt.u32.totalorder %s767_s2, %s1061_s20 }
  0x59   : > { %p770_p2 = pnand %p768_p5, %p739_p0 }
  0x5a   : > { %p775_p10 = por %p774_p8, %p773_p6 }
  0x5b   : > { %p771_p4 = pneg %p770_p2 }
  0x5c   : > { %p777_p3 = por %p776_p13, %p775_p10 }
  0x5e   : > { %p778_p7 = pnand %p777_p3, %p771_p4 }
  0x60   : > { %781 = shalt.err (!%p778_p7)
}
  0x61   : > { %s782_s10 = scalar_lea.vmem %s1063_s25, 256  ;;  %s877_s11 = smov [#allocation6]  }
  0x62   : > { %p783_p9 = scmp.ne.s32.totalorder %s1063_s25, %s782_s10  ;;  %s787_s14 = sshll.u32 %s877_s11, 4  ;;  %s788_s14 = int_to_ptr.vmem [resolvable:$false] %s787_s14 }
  0x63   : > { %s789_s6 = scalar_lea.vmem %s788_s14, 512  ;;  %p790_p2 = scmp.lt.s32.totalorder %s1063_s25, %s788_s14 }
  0x64   : > { %p785_p1 = pnand %p783_p9, %p739_p0  ;;  %p791_p6 = scmp.lt.s32.totalorder %s789_s6, %s782_s10 }
  0x66   : > { %p786_p5 = pneg %p785_p1  ;;  %p792_p8 = por %p791_p6, %p790_p2 }
  0x68   : > { %p793_p10 = pnand %p792_p8, %p786_p5 }
  0x6a   : > { %796 = shalt.err (!%p793_p10)
}
  0x6b   : > { %s878_s2 = smov 128   ;;  %s879_s7 = smov 8  }
  0x6c   : > { %646 = dma.hbm_to_vmem [thread:$0]  (!%p1018_p11), %s1061_s20, 256, %s1063_s25, %s1067_s0, %s878_s2, %s878_s2, %s879_s7  }
  0x6d   : > { %p1197_p0 = scmp.ne.s32.totalorder %s1190_s23, 0 }
  0x6e   : > { %s1096_s28 = sand.u32 (!%p1197_p0), 1, %s863_s16   ;;  %p1198_p4 = scmp.ne.s32.totalorder (!%p1197_p0), %s1188_s21, 0 }
  0x6f   : > { %221 = sbr.rel (%p1197_p0) target bundleno = 484 (0x1e4), region = 36  ;;  %s595_s5 = sshll.u32 (!%p1197_p0), %s1096_s28, 3 }
  0x70   : > { %s224_s12 = scalar_lea.sflag (!%p1197_p0), [#allocation4], %s1096_s28  ;;  %s227_s13 = scalar_lea.vmem (!%p1197_p0), [#allocation3], %s595_s5 }
  0x76   : > { %842 = dma.done.wait (%p1198_p4), %s224_s12, 128  }
  0x77   : > { %844 = vsyncadd (%p1198_p4), %s224_s12, 4294967168  ;;  %s232_s0 = sand.u32 1, %s931_s19   ;;  %s596_s23 = sshll.u32 %s1096_s28, 4 }
  0x78   : > { %s233_s9 = scalar_lea.sflag [#allocation7], %s232_s0  ;;  %s1108_s20 = scalar_lea.vmem [#allocation6], %s596_s23 }
  0x79   : > { %846 = dma.done.wait (%p1198_p4), %s233_s9, 256  }
  0x7a   : > { %848 = vsyncadd (%p1198_p4), %s233_s9, 4294967040  ;;  %p1199_p11 = scmp.eq.s32.totalorder %s931_s19, 0 }
  0x7c   : > { %850 = dma.done.wait (%p1199_p11), [#allocation7], 1536   ;;  %p1200_p13 = pmov %p1199_p11 }
  0x7d   : > { %v880_v0 = vmov 0   ;;  %v696_v1 = vld [vmem:[%s227_s13] sm:$0xff]   ;;  %v697_v2 = vld [vmem:[#allocation8] sm:$0xff]   ;;  %s881_s25 = smov 64   ;;  %v698_v3 = vld [vmem:[#allocation8 + $0x8] sm:$0xff]   ;;  %vm277_vm0 = vcmask 1040384  }
  0x7e   : > { %852 = vsyncadd (%p1200_p13), [#allocation7], 4294965760  ;;  %416 = vmatprep.subr.bf16.mxu0 %v880_v0  ;;  %301 = vrot.lane.b32.xlu0 %v696_v1, %s881_s25  ;;  %v699_v4 = vld [vmem:[#allocation8 + $0x10] sm:$0xff]   ;;  %v700_v5 = vld [vmem:[#allocation8 + $0x18] sm:$0xff]   ;;  %vm284_vm1 = vcmask 1046528   ;;  %vm292_vm2 = vcmask 523264  }
  0x7f   : > { %417 = vmatpush1.bf16.msra.mxu0 %v697_v2  ;;  %v623_v6 = vld [vmem:[%s227_s13] sm:$0xff]   ;;  %v701_v9 = vld [vmem:[#allocation8 + $0x20] sm:$0xff]   ;;  %v702_v18 = vld [vmem:[#allocation8 + $0x28] sm:$0xff]   ;;  %vm304_vm3 = vcmask 1048064   ;;  %s269_s29 = scalar_lea.vmem [#allocation9], %s596_s23  ;;  %s621_s10 = sshll.u32 %s931_s19, 8 }
  0x80   : > { %418 = vmatprep.subr.bf16.mxu0 %v880_v0  ;;  %v624_v7 = vunpack.c.l.bf16 %v623_v6  ;;  %v625_v8 = vunpack.c.h.bf16 %v623_v6  ;;  %v703_v21 = vld [vmem:[#allocation8 + $0x30] sm:$0xff]   ;;  %v704_v22 = vld [vmem:[#allocation8 + $0x38] sm:$0xff]   ;;  %v705_v24 = vld [vmem:[#allocation8 + $0x40] sm:$0xff]   ;;  %s479_s8 = sshll.u32 %s269_s29, 4  ;;  %s1134_s6 = scalar_lea.hbm %s1182_s4, %s621_s10  ;;  %s1129_s8 = int_to_ptr.vmem [resolvable:$true] %s479_s8 }
  0x81   : > { %v706_v25 = vld [vmem:[#allocation8 + $0x48] sm:$0xff]   ;;  %v707_v26 = vld [vmem:[#allocation8 + $0x50] sm:$0xff]   ;;  %v708_v27 = vld [vmem:[#allocation8 + $0x58] sm:$0xff]   ;;  %s466_s2 = scalar_lea.sflag [#allocation5], %s1096_s28  ;;  %s797_s7 = scalar_lea.vmem %s1129_s8, 256 }
  0x82   : > { %v278_v10 = vrot.slane %v624_v7, 7  ;;  %v279_v11 = vrot.slane %v625_v8, 7  ;;  %v285_v12 = vrot.slane %v624_v7, 1  ;;  %v286_v13 = vrot.slane %v625_v8, 1  ;;  %v600_v30 = vld [vmem:[%s1181_s3] ss:$0 sm:$0xff]  ;;  %p798_p3 = scmp.ne.s32.totalorder %s1129_s8, %s797_s7 }
  0x83   : > { %419 = vmatpush1.bf16.msra.mxu0 %v698_v3  ;;  %v459_v34 = vld [vmem:[%s1108_s20] sm:$0xff]  ;;  %v460_v39 = vld [vmem:[%s1108_s20 + $0x8] sm:$0xff]  ;;  %s882_s19 = smov [#allocation9]  }
  0x84   : > { %420 = vmatprep.subr.bf16.mxu0 %v880_v0  ;;  %v280_v14 = vsel %vm277_vm0, %v278_v10, %v279_v11  ;;  %v283_v15 = vsel %vm277_vm0, 0.0, %v278_v10  ;;  %v287_v16 = vsel %vm284_vm1, %v285_v12, %v286_v13  ;;  %v290_v17 = vsel %vm284_vm1, %v286_v13, 0.0  ;;  %p799_p7 = pnand %p798_p3, %p1004_p12  ;;  %s801_s5 = sshll.u32 %s882_s19, 4  ;;  %s802_s5 = int_to_ptr.vmem [resolvable:$false] %s801_s5 }
  0x85   : > { %v291_v19 = vpack.c.bf16 %v280_v14, %v283_v15  ;;  %v306_v20 = vpack.c.bf16 %v290_v17, %v287_v16  ;;  %s803_s12 = scalar_lea.vmem %s802_s5, 512  ;;  %p804_p1 = scmp.lt.s32.totalorder %s1129_s8, %s802_s5 }
  0x86   : > { %p800_p9 = pneg %p799_p7  ;;  %p805_p5 = scmp.lt.s32.totalorder %s803_s12, %s797_s7 }
  0x87   : > { %421 = vmatpush1.bf16.msra.mxu0 %v699_v4  ;;  %293 = vst.msk [vmem:[#allocation2] sm:$0xff] %vm292_vm2, %v291_v19  ;;  %307 = vst.msk [vmem:[#allocation2 + $0x8] sm:$0xff] %vm292_vm2, %v306_v20 }
  0x88   : > { %422 = vmatprep.subr.bf16.mxu0 %v880_v0  ;;  %p806_p2 = por %p805_p5, %p804_p1 }
  0x8a   : > { %p807_p6 = pnand %p806_p2, %p800_p9 }
  0x8b   : > { %423 = vmatpush1.bf16.msra.mxu0 %v700_v5 }
  0x8c   : > { %424 = vmatprep.subr.bf16.mxu0 %v880_v0 }
  0x8e   : > { %v309_v23 = vld [vmem:[#allocation2 + $0x8] sm:$0xff] }
  0x8f   : > { %425 = vmatpush1.bf16.msra.mxu0 %v701_v9  ;;  %613 = vmatprep.mubr.msk.bf16.mxu0 %vm292_vm2, %v309_v23 }
  0x90   : > { %426 = vmatprep.subr.bf16.mxu0 %v880_v0 }
  0x93   : > { %427 = vmatpush1.bf16.msra.mxu0 %v702_v18 }
  0x94   : > { %428 = vmatprep.subr.bf16.mxu0 %v880_v0 }
  0x97   : > { %429 = vmatpush1.bf16.msra.mxu0 %v703_v21 }
  0x98   : > { %430 = vmatprep.subr.bf16.mxu0 %v880_v0 }
  0x9b   : > { %431 = vmatpush1.bf16.msra.mxu0 %v704_v22 }
  0x9c   : > { %432 = vmatprep.subr.bf16.mxu0 %v880_v0 }
  0x9f   : > { %433 = vmatpush1.bf16.msra.mxu0 %v705_v24 }
  0xa0   : > { %434 = vmatprep.subr.bf16.mxu0 %v880_v0 }
  0xa3   : > { %435 = vmatpush1.bf16.msra.mxu0 %v706_v25 }
  0xa4   : > { %436 = vmatprep.subr.bf16.mxu0 %v880_v0 }
  0xa7   : > { %437 = vmatpush1.bf16.msra.mxu0 %v707_v26 }
  0xa8   : > { %438 = vmatprep.subr.bf16.mxu0 %v880_v0 }
  0xab   : > { %439 = vmatpush1.bf16.msra.mxu0 %v708_v27 }
  0xf0   : > { %v302_v28 = vpop.permute.xlu0 %301 }
  0xf1   : > { %305 = vst.msk [vmem:[#allocation2] sm:$0xff] %vm304_vm3, %v302_v28 }
  0xf8   : > { %v308_v29 = vld [vmem:[#allocation2] sm:$0xff] }
  0xf9   : > { %449 = vmatmul.mubr.bf16.vlgmr.msra.gmra.mrb[0].mxu0 %v308_v29 }
 0x1cc   : > { %v450_v31 = vpop.f32.mrb[0].mxu0 }
 0x1cd   : > { %v451_v32 = vadd.f32 %v600_v30, %v450_v31  ;;  %v452_v33 = vpop.f32.mrb[1].mxu0 }
 0x1ce   : > { %v453_v35 = vpop.f32.mrb[2].mxu0 }
 0x1cf   : > { %v457_v36 = vmax.f32 %v451_v32, 0.0  ;;  %v454_v37 = vadd.f32 %v600_v30, %v453_v35  ;;  %v455_v38 = vpop.f32.mrb[3].mxu0 }
 0x1d1   : > { %v461_v40 = vadd.f32 %v459_v34, %v457_v36  ;;  %v458_v41 = vmax.f32 %v454_v37, 0.0 }
 0x1d3   : > { %463 = vst [vmem:[%s269_s29] sm:$0xff] %v461_v40  ;;  %v462_v42 = vadd.f32 %v460_v39, %v458_v41 }
 0x1d5   : > { %464 = vst [vmem:[%s269_s29 + $0x8] sm:$0xff] %v462_v42 }
 0x1d6   : > { %810 = shalt.err (!%p807_p6)
}
 0x1d7   : > { %s811_s13 = scalar_lea.hbm %s1134_s6, 256  ;;  %s815_s9 = scalar_lea.hbm %s1182_s4, 512 }
 0x1d8   : > { %p812_p8 = scmp.ne.s32.totalorder %s1134_s6, %s811_s13  ;;  %p816_p4 = scmp.lt.u32.totalorder %s1134_s6, %s1182_s4 }
 0x1d9   : > { %p817_p11 = scmp.lt.u32.totalorder %s815_s9, %s811_s13  ;;  %p819_p3 = scmp.lt.u32.totalorder %s811_s13, %s1134_s6 }
 0x1da   : > { %p813_p10 = pnand %p812_p8, %p1004_p12 }
 0x1db   : > { %p818_p13 = por %p817_p11, %p816_p4 }
 0x1dc   : > { %p814_p0 = pneg %p813_p10 }
 0x1dd   : > { %p820_p7 = por %p819_p3, %p818_p13 }
 0x1df   : > { %p821_p9 = pnand %p820_p7, %p814_p0 }
 0x1e1   : > { %824 = shalt.err (!%p821_p9)
}
 0x1e2   : > { %s883_s21 = smov 128   ;;  %s884_s26 = smov 8  }
 0x1e3   : > { %634 = dma.vmem_to_hbm [thread:$0]  (%p1004_p12), %s1129_s8, 256, %s1134_s6, %s466_s2, %s883_s21, %s883_s21, %s884_s26  }
 0x1e4 PF: > { %s494_s29 = sand.u32 1, %s859_s15   ;;  %p1201_p1 = scmp.ne.s32.totalorder %s1189_s22, 0 }
 0x1e5   : > { %p1202_p5 = scmp.ge.s32.totalorder %s871_s18, 2  ;;  %s495_s10 = scalar_lea.sflag [#allocation5], %s494_s29 }
 0x1e7   : > { %p648_p2 = pnand %p1202_p5, %p1201_p1 }
 0x1e9   : > { %854 = dma.done.wait (!%p648_p2), %s495_s10, 256  }
 0x1ea   : > { %856 = vsyncadd (!%p648_p2), %s495_s10, 4294967040  ;;  %p20_p6 = scmp.ge.s32.totalorder %s966_s27, 4   ;;  %s1203_s15 = smov %s863_s16 }
 0x1eb   : > { %s1204_s16 = smov %s867_s17  ;;  %s1205_s17 = smov %s1000_s24 }
 0x1ec   : > { %s1206_s18 = smov %s966_s27  ;;  %22 = sbr.rel (!%p20_p6) target bundleno = 10 (0xa), region = 98 }
 0x1f3   :  { %500 = vsyncpa [#allocation4], 1 }
 0x1f4   :  { %502 = vsyncpa [#allocation4 + $0x1], 1 }
 0x1f5   :  { %503 = vsyncpa [#allocation7], 1 }
 0x1f6   :  { %505 = vsyncpa [#allocation7 + $0x1], 1 }
 0x1f7   :  { %506 = vsyncpa [#allocation5], 1 }
 0x1f8   :  { %508 = vsyncpa [#allocation5 + $0x1], 1 }

</bundles_post_ra>
